<compile_context>
chip_gen: v6e
topology: v6e:2x2x1
jax: 0.10.0
libtpu: 0.0.40
codegen_flags: <defaults>
</compile_context>

<pallas_src>
import functools

import jax
import jax.numpy as jnp
from jax.experimental import pallas as pl
from jax.experimental.pallas import tpu as pltpu


def _reward_scaling_kernel(r_ref, o_ref, *, gamma, epsilon, unroll):
    """Scalar-unit sequential scan.

    r_ref: SMEM f32[N]  -- flattened rewards
    o_ref: SMEM f32[N]  -- scaled rewards
    """
    n = r_ref.shape[0]

    g = jnp.float32(gamma)
    inv_eps = jnp.float32(1.0 / epsilon)   # hoisted: clamp for inverse std
    one = jnp.float32(1.0)
    zero = jnp.float32(0.0)
    tiny = jnp.float32(1e-8)

    # Peeled iteration 0: count == 1 -> std = 1.0, clamped below by epsilon,
    # i.e. inv_std = min(1.0, 1/eps).  Carry after it: R_t = r0, mean = r0,
    # var_sum = 0.
    r0 = r_ref[0]
    o_ref[0] = r0 * jnp.minimum(one, inv_eps)

    def body(i, carry):
        r_t, mean, var_sum = carry
        r = r_ref[i]                              # scalar SMEM load
        # discounted running return
        r_t = g * r_t + r
        # Welford running statistics update; counter derived from loop index:
        # count = i + 1, count - 1 = i  (no loop-carried float counter).
        i_f = i.astype(jnp.float32)
        delta = r_t - mean
        mean = mean + delta / (i_f + one)
        var_sum = var_sum + delta * (r_t - mean)
        # inverse std (count >= 2 here), clamped by 1/epsilon; off the carry chain
        inv_std = jnp.minimum(jax.lax.rsqrt(var_sum / (i_f + tiny)), inv_eps)
        o_ref[i] = r * inv_std                    # scalar SMEM store
        return r_t, mean, var_sum

    if n > 1:
        jax.lax.fori_loop(1, n, body, (r0, r0, zero), unroll=unroll)


def reward_scaling(rewards, gamma=0.99, epsilon=1e-8):
    """Pallas-backed RewardScaling.forward (stateless; starts from zero state).

    # TODO(synk): the nn.Module carries R_t / running statistics across forward
    # calls; this kernel starts from fresh (zero) state on every call.
    """
    rewards = jnp.asarray(rewards, dtype=jnp.float32)
    orig_shape = rewards.shape
    flat = rewards.reshape(-1)            # 1-D, lives in SMEM inside the kernel
    n = flat.shape[0]
    if n == 0:
        return rewards

    # Unroll factor for the (n-1)-trip steady-state loop: fully unroll small
    # batches, x8 otherwise.
    trip = n - 1
    unroll = trip if 0 < trip <= 64 else (8 if trip > 64 else 1)

    out = pl.pallas_call(
        functools.partial(
            _reward_scaling_kernel, gamma=gamma, epsilon=epsilon, unroll=unroll
        ),
        out_shape=jax.ShapeDtypeStruct((n,), jnp.float32),
        in_specs=[pl.BlockSpec(memory_space=pltpu.MemorySpace.SMEM)],
        out_specs=pl.BlockSpec(memory_space=pltpu.MemorySpace.SMEM),
    )(flat)
    return out.reshape(orig_shape)


def _reference(rewards, gamma=0.99, epsilon=1e-8):
    """Pure-Python reference mirroring the PyTorch module exactly."""
    import numpy as np

    rewards = np.asarray(rewards, dtype=np.float32)
    flat = rewards.flatten()
    out = np.zeros_like(flat)
    r_t, count, mean, var_sum = 0.0, 0, 0.0, 0.0
    for i, r in enumerate(flat):
        r_t = gamma * r_t + float(r)
        count += 1
        delta = r_t - mean
        mean += delta / count
        var_sum += delta * (r_t - mean)
        std = 1.0 if count < 2 else (var_sum / (count - 1 + 1e-8)) ** 0.5
        std = max(std, epsilon)
        out[i] = r / std
    return out.reshape(rewards.shape)


if __name__ == "__main__":
    key = jax.random.PRNGKey(0)
    # rewards of shape [batch_size] = [8], consistent with the module's forward
    rewards = jax.random.normal(key, (8,), dtype=jnp.float32)

    scaled = reward_scaling(rewards, gamma=0.99, epsilon=1e-8)
    scaled = jax.block_until_ready(scaled)

    import numpy as np

    ref = _reference(np.asarray(rewards))
    np.testing.assert_allclose(np.asarray(scaled), ref, rtol=1e-5, atol=1e-5)

    print("KERNEL_OK")
</pallas_src>

<mosaic_0001>
module attributes {stable_mosaic.version = 11 : i64} {
  func.func @_reward_scaling_kernel(%arg0: memref<8xf32, #tpu.memory_space<smem>>, %arg1: memref<8xf32, #tpu.memory_space<smem>>) attributes {dimension_semantics = [], scalar_prefetch = 0 : i64, scratch_operands = 0 : i64, tpu.core_type = #tpu.core_type<tc>} {
    %c0 = arith.constant 0 : index
    %0 = memref.load %arg0[%c0] : memref<8xf32, #tpu.memory_space<smem>>
    %cst = arith.constant 1.000000e+00 : f32
    %cst_0 = arith.constant 1.000000e+08 : f32
    %1 = arith.minimumf %cst, %cst_0 : f32
    %2 = arith.mulf %0, %1 : f32
    %c0_1 = arith.constant 0 : index
    %3 = memref.load %arg1[%c0_1] : memref<8xf32, #tpu.memory_space<smem>>
    memref.store %2, %arg1[%c0_1] : memref<8xf32, #tpu.memory_space<smem>>
    %cst_2 = arith.constant 9.900000e-01 : f32
    %cst_3 = arith.constant 1.000000e+00 : f32
    %cst_4 = arith.constant 9.99999993E-9 : f32
    %cst_5 = arith.constant 1.000000e+08 : f32
    %cst_6 = arith.constant 0.000000e+00 : f32
    %c1_i32 = arith.constant 1 : i32
    %4 = arith.index_cast %c1_i32 : i32 to index
    %5 = memref.load %arg0[%4] : memref<8xf32, #tpu.memory_space<smem>>
    %6 = arith.mulf %cst_2, %0 : f32
    %7 = arith.addf %6, %5 : f32
    %8 = arith.sitofp %c1_i32 : i32 to f32
    %9 = arith.subf %7, %0 : f32
    %10 = arith.addf %8, %cst_3 : f32
    %11 = arith.divf %9, %10 : f32
    %12 = arith.addf %0, %11 : f32
    %13 = arith.subf %7, %12 : f32
    %14 = arith.mulf %9, %13 : f32
    %15 = arith.addf %cst_6, %14 : f32
    %16 = arith.addf %8, %cst_4 : f32
    %17 = arith.divf %15, %16 : f32
    %18 = math.rsqrt %17 : f32
    %19 = arith.minimumf %18, %cst_5 : f32
    %20 = arith.mulf %5, %19 : f32
    %21 = arith.index_cast %c1_i32 : i32 to index
    %22 = memref.load %arg1[%21] : memref<8xf32, #tpu.memory_space<smem>>
    memref.store %20, %arg1[%21] : memref<8xf32, #tpu.memory_space<smem>>
    %c2_i32 = arith.constant 2 : i32
    %23 = arith.index_cast %c2_i32 : i32 to index
    %24 = memref.load %arg0[%23] : memref<8xf32, #tpu.memory_space<smem>>
    %25 = arith.mulf %cst_2, %7 : f32
    %26 = arith.addf %25, %24 : f32
    %27 = arith.sitofp %c2_i32 : i32 to f32
    %28 = arith.subf %26, %12 : f32
    %29 = arith.addf %27, %cst_3 : f32
    %30 = arith.divf %28, %29 : f32
    %31 = arith.addf %12, %30 : f32
    %32 = arith.subf %26, %31 : f32
    %33 = arith.mulf %28, %32 : f32
    %34 = arith.addf %15, %33 : f32
    %35 = arith.addf %27, %cst_4 : f32
    %36 = arith.divf %34, %35 : f32
    %37 = math.rsqrt %36 : f32
    %38 = arith.minimumf %37, %cst_5 : f32
    %39 = arith.mulf %24, %38 : f32
    %40 = arith.index_cast %c2_i32 : i32 to index
    %41 = memref.load %arg1[%40] : memref<8xf32, #tpu.memory_space<smem>>
    memref.store %39, %arg1[%40] : memref<8xf32, #tpu.memory_space<smem>>
    %c3_i32 = arith.constant 3 : i32
    %42 = arith.index_cast %c3_i32 : i32 to index
    %43 = memref.load %arg0[%42] : memref<8xf32, #tpu.memory_space<smem>>
    %44 = arith.mulf %cst_2, %26 : f32
    %45 = arith.addf %44, %43 : f32
    %46 = arith.sitofp %c3_i32 : i32 to f32
    %47 = arith.subf %45, %31 : f32
    %48 = arith.addf %46, %cst_3 : f32
    %49 = arith.divf %47, %48 : f32
    %50 = arith.addf %31, %49 : f32
    %51 = arith.subf %45, %50 : f32
    %52 = arith.mulf %47, %51 : f32
    %53 = arith.addf %34, %52 : f32
    %54 = arith.addf %46, %cst_4 : f32
    %55 = arith.divf %53, %54 : f32
    %56 = math.rsqrt %55 : f32
    %57 = arith.minimumf %56, %cst_5 : f32
    %58 = arith.mulf %43, %57 : f32
    %59 = arith.index_cast %c3_i32 : i32 to index
    %60 = memref.load %arg1[%59] : memref<8xf32, #tpu.memory_space<smem>>
    memref.store %58, %arg1[%59] : memref<8xf32, #tpu.memory_space<smem>>
    %c4_i32 = arith.constant 4 : i32
    %61 = arith.index_cast %c4_i32 : i32 to index
    %62 = memref.load %arg0[%61] : memref<8xf32, #tpu.memory_space<smem>>
    %63 = arith.mulf %cst_2, %45 : f32
    %64 = arith.addf %63, %62 : f32
    %65 = arith.sitofp %c4_i32 : i32 to f32
    %66 = arith.subf %64, %50 : f32
    %67 = arith.addf %65, %cst_3 : f32
    %68 = arith.divf %66, %67 : f32
    %69 = arith.addf %50, %68 : f32
    %70 = arith.subf %64, %69 : f32
    %71 = arith.mulf %66, %70 : f32
    %72 = arith.addf %53, %71 : f32
    %73 = arith.addf %65, %cst_4 : f32
    %74 = arith.divf %72, %73 : f32
    %75 = math.rsqrt %74 : f32
    %76 = arith.minimumf %75, %cst_5 : f32
    %77 = arith.mulf %62, %76 : f32
    %78 = arith.index_cast %c4_i32 : i32 to index
    %79 = memref.load %arg1[%78] : memref<8xf32, #tpu.memory_space<smem>>
    memref.store %77, %arg1[%78] : memref<8xf32, #tpu.memory_space<smem>>
    %c5_i32 = arith.constant 5 : i32
    %80 = arith.index_cast %c5_i32 : i32 to index
    %81 = memref.load %arg0[%80] : memref<8xf32, #tpu.memory_space<smem>>
    %82 = arith.mulf %cst_2, %64 : f32
    %83 = arith.addf %82, %81 : f32
    %84 = arith.sitofp %c5_i32 : i32 to f32
    %85 = arith.subf %83, %69 : f32
    %86 = arith.addf %84, %cst_3 : f32
    %87 = arith.divf %85, %86 : f32
    %88 = arith.addf %69, %87 : f32
    %89 = arith.subf %83, %88 : f32
    %90 = arith.mulf %85, %89 : f32
    %91 = arith.addf %72, %90 : f32
    %92 = arith.addf %84, %cst_4 : f32
    %93 = arith.divf %91, %92 : f32
    %94 = math.rsqrt %93 : f32
    %95 = arith.minimumf %94, %cst_5 : f32
    %96 = arith.mulf %81, %95 : f32
    %97 = arith.index_cast %c5_i32 : i32 to index
    %98 = memref.load %arg1[%97] : memref<8xf32, #tpu.memory_space<smem>>
    memref.store %96, %arg1[%97] : memref<8xf32, #tpu.memory_space<smem>>
    %c6_i32 = arith.constant 6 : i32
    %99 = arith.index_cast %c6_i32 : i32 to index
    %100 = memref.load %arg0[%99] : memref<8xf32, #tpu.memory_space<smem>>
    %101 = arith.mulf %cst_2, %83 : f32
    %102 = arith.addf %101, %100 : f32
    %103 = arith.sitofp %c6_i32 : i32 to f32
    %104 = arith.subf %102, %88 : f32
    %105 = arith.addf %103, %cst_3 : f32
    %106 = arith.divf %104, %105 : f32
    %107 = arith.addf %88, %106 : f32
    %108 = arith.subf %102, %107 : f32
    %109 = arith.mulf %104, %108 : f32
    %110 = arith.addf %91, %109 : f32
    %111 = arith.addf %103, %cst_4 : f32
    %112 = arith.divf %110, %111 : f32
    %113 = math.rsqrt %112 : f32
    %114 = arith.minimumf %113, %cst_5 : f32
    %115 = arith.mulf %100, %114 : f32
    %116 = arith.index_cast %c6_i32 : i32 to index
    %117 = memref.load %arg1[%116] : memref<8xf32, #tpu.memory_space<smem>>
    memref.store %115, %arg1[%116] : memref<8xf32, #tpu.memory_space<smem>>
    %c7_i32 = arith.constant 7 : i32
    %118 = arith.index_cast %c7_i32 : i32 to index
    %119 = memref.load %arg0[%118] : memref<8xf32, #tpu.memory_space<smem>>
    %120 = arith.mulf %cst_2, %102 : f32
    %121 = arith.addf %120, %119 : f32
    %122 = arith.sitofp %c7_i32 : i32 to f32
    %123 = arith.subf %121, %107 : f32
    %124 = arith.addf %122, %cst_3 : f32
    %125 = arith.divf %123, %124 : f32
    %126 = arith.addf %107, %125 : f32
    %127 = arith.subf %121, %126 : f32
    %128 = arith.mulf %123, %127 : f32
    %129 = arith.addf %110, %128 : f32
    %130 = arith.addf %122, %cst_4 : f32
    %131 = arith.divf %129, %130 : f32
    %132 = math.rsqrt %131 : f32
    %133 = arith.minimumf %132, %cst_5 : f32
    %134 = arith.mulf %119, %133 : f32
    %135 = arith.index_cast %c7_i32 : i32 to index
    %136 = memref.load %arg1[%135] : memref<8xf32, #tpu.memory_space<smem>>
    memref.store %134, %arg1[%135] : memref<8xf32, #tpu.memory_space<smem>>
    %c7_i32_7 = arith.constant 7 : i32
    return
  }
}

</mosaic_0001>

<bundles_post_ra>
// kernel: tpu_custom_call.1
= control target key start
LH: loop header
LB: loop body
LE: loop exit
PB: predicated region body
PF: predicated region fallthrough
CT: control target
= control target key end

     0   :  { %6 = vsyncpa [#allocation3], 0  ;;  %s286_s0 = inlined_call_operand.hbm [shape: f32[8], index: 0, kind: input, shape index: {}]   ;;  %s287_s1 = inlined_call_operand.hbm [shape: f32[8], index: 1, kind: output, shape index: {}]  }
   0x1   :  { %7 = vsyncpa [#allocation4], 0  ;;  %s239_s6 = smov [#allocation2]  }
   0x2   :  { %15 = dma.hbm_to_smem %s286_s0, 16, %s239_s6, [#allocation3]  }
   0x3   :  { %235 = dma.done.wait [#allocation3], 16  }
   0x4   :  { %236 = vsyncadd [#allocation3], 4294967280 }
   0x5   :  { %19 = sfence }
   0x6   :  { %s20_s9 = sld [smem:[#allocation2]] }
   0x7   :  { %s255_s10 = sld [smem:[#allocation2 + $0x1]] }
   0x8   :  { %s257_s11 = sld [smem:[#allocation2 + $0x2]] }
   0x9   :  { %s260_s17 = sld [smem:[#allocation2 + $0x3]] }
   0xa   :  { %s263_s23 = sld [smem:[#allocation2 + $0x4]] }
   0xb   :  { %s266_s2 = sld [smem:[#allocation2 + $0x5]] }
   0xc   :  { %s24_s12 = smul.f32 0.99, %s20_s9  ;;  %22 = sst [smem:[#allocation5]] %s20_s9 }
   0xe   :  { %s25_s13 = sadd.f32 %s255_s10, %s24_s12 }
  0x10   :  { %s26_s14 = ssub.f32 %s25_s13, %s20_s9  ;;  %s42_s15 = smul.f32 0.99, %s25_s13 }
  0x12   :  { %s29_s16 = smul.f32 0.5, %s26_s14  ;;  %s43_s0 = sadd.f32 %s257_s11, %s42_s15 }
  0x14   :  { %s30_s18 = sadd.f32 %s29_s16, %s20_s9  ;;  %s63_s20 = smul.f32 0.99, %s43_s0 }
  0x16   :  { %s31_s19 = ssub.f32 %s25_s13, %s30_s18 }
  0x17   :  { %s44_s21 = ssub.f32 %s43_s0, %s30_s18 }
  0x18   :  { %s32_s22 = smul.f32 %s31_s19, %s26_s14  ;;  %s64_s25 = sadd.f32 %s260_s17, %s63_s20 }
  0x19   :  { %s47_s24 = smul.f32 0.33333334, %s44_s21  ;;  %s269_s14 = sld [smem:[#allocation2 + $0x6]] }
  0x1a   :  { %v34_v0 = vstv %s32_s22  ;;  %s84_s27 = smul.f32 0.99, %s64_s25 }
  0x1b   :  { %205 = vrsqrt.f32 %v34_v0  ;;  %s48_s26 = sadd.f32 %s47_s24, %s30_s18 }
  0x1c   :  { %s85_s4 = sadd.f32 %s263_s23, %s84_s27 }
  0x1d   :  { %s49_s28 = ssub.f32 %s43_s0, %s48_s26 }
  0x1e   :  { %s65_s29 = ssub.f32 %s64_s25, %s48_s26  ;;  %s105_s7 = smul.f32 0.99, %s85_s4 }
  0x1f   :  { %s50_s30 = smul.f32 %s49_s28, %s44_s21 }
  0x20   :  { %s68_s3 = smul.f32 0.25, %s65_s29  ;;  %s106_s16 = sadd.f32 %s266_s2, %s105_s7 }
  0x21   :  { %s51_s5 = sadd.f32 %s50_s30, %s32_s22 }
  0x22   :  { %s69_s6 = sadd.f32 %s68_s3, %s48_s26  ;;  %s126_s19 = smul.f32 0.99, %s106_s16 }
  0x23   :  { %s54_s8 = smul.f32 0.5, %s51_s5 }
  0x24   :  { %s70_s9 = ssub.f32 %s64_s25, %s69_s6 }
  0x25   :  { %v55_v1 = vstv %s54_s8  ;;  %s86_s12 = ssub.f32 %s85_s4, %s69_s6 }
  0x26   :  { %207 = vrsqrt.f32 %v55_v1  ;;  %s71_s13 = smul.f32 %s70_s9, %s65_s29  ;;  %s272_s25 = sld [smem:[#allocation2 + $0x7]] }
  0x27   :  { %s89_s15 = smul.f32 0.2, %s86_s12  ;;  %s127_s27 = sadd.f32 %s269_s14, %s126_s19 }
  0x28   :  { %v206_v2 = vpop.eup %205  ;;  %s72_s0 = sadd.f32 %s71_s13, %s51_s5 }
  0x29   :  { %188 = vpush %v206_v2  ;;  %s90_s18 = sadd.f32 %s89_s15, %s69_s6  ;;  %s147_s30 = smul.f32 0.99, %s127_s27 }
  0x2a   :  { %s75_s20 = smul.f32 0.33333334, %s72_s0 }
  0x2b   :  { %s91_s21 = ssub.f32 %s85_s4, %s90_s18 }
  0x2c   :  { %v76_v3 = vstv %s75_s20  ;;  %s107_s22 = ssub.f32 %s106_s16, %s90_s18 }
  0x2d   :  { %209 = vrsqrt.f32 %v76_v3  ;;  %s92_s24 = smul.f32 %s91_s21, %s86_s12  ;;  %s148_s8 = sadd.f32 %s272_s25, %s147_s30 }
  0x2e   :  { %s110_s26 = smul.f32 0.16666667, %s107_s22 }
  0x2f   :  { %s93_s28 = sadd.f32 %s92_s24, %s72_s0 }
  0x30   :  { %s111_s29 = sadd.f32 %s110_s26, %s90_s18 }
  0x31   :  { %s96_s3 = smul.f32 0.25, %s93_s28 }
  0x32   :  { %s112_s7 = ssub.f32 %s106_s16, %s111_s29 }
  0x33   :  { %v208_v4 = vpop.eup %207  ;;  %s128_s5 = ssub.f32 %s127_s27, %s111_s29  ;;  %v97_v5 = vstv %s96_s3 }
  0x34   :  { %s113_s6 = smul.f32 %s112_s7, %s107_s22  ;;  %190 = vpush %v208_v4  ;;  %211 = vrsqrt.f32 %v97_v5 }
  0x35   :  { %s131_s4 = smul.f32 0.14285715, %s128_s5 }
  0x36   :  { %s114_s9 = sadd.f32 %s113_s6, %s93_s28 }
  0x37   :  { %s132_s12 = sadd.f32 %s131_s4, %s111_s29  ;;  %s240_s29 = smov 1e+08  }
  0x38   :  { %s117_s13 = smul.f32 0.2, %s114_s9 }
  0x39   :  { %s133_s15 = ssub.f32 %s127_s27, %s132_s12 }
  0x3a   :  { %v210_v6 = vpop.eup %209  ;;  %v118_v7 = vstv %s117_s13  ;;  %s149_s19 = ssub.f32 %s148_s8, %s132_s12 }
  0x3b   :  { %s134_s0 = smul.f32 %s133_s15, %s128_s5  ;;  %192 = vpush %v210_v6  ;;  %213 = vrsqrt.f32 %v118_v7 }
  0x3c   :  { %s152_s18 = smul.f32 0.125, %s149_s19 }
  0x3d   :  { %s135_s16 = sadd.f32 %s134_s0, %s114_s9 }
  0x3e   :  { %s153_s20 = sadd.f32 %s152_s18, %s132_s12 }
  0x3f   :  { %s138_s21 = smul.f32 0.16666667, %s135_s16 }
  0x40   :  { %s154_s24 = ssub.f32 %s148_s8, %s153_s20 }
  0x41   :  { %v212_v8 = vpop.eup %211  ;;  %v139_v9 = vstv %s138_s21 }
  0x42   :  { %194 = vpush %v212_v8  ;;  %215 = vrsqrt.f32 %v139_v9  ;;  %s155_s22 = smul.f32 %s154_s24, %s149_s19 }
  0x44   :  { %s156_s26 = sadd.f32 %s155_s22, %s135_s16  ;;  %s241_s22 = smov [#allocation5]  }
  0x46   :  { %s159_s28 = smul.f32 0.14285715, %s156_s26 }
  0x48   :  { %v214_v10 = vpop.eup %213  ;;  %v160_v11 = vstv %s159_s28 }
  0x49   :  { %196 = vpush %v214_v10  ;;  %217 = vrsqrt.f32 %v160_v11 }
  0x4f   :  { %v216_v12 = vpop.eup %215 }
  0x50   :  { %198 = vpush %v216_v12 }
  0x56   :  { %v218_v13 = vpop.eup %217 }
  0x57   :  { %200 = vpush %v218_v13 }
  0x5a   :  { %s189_s27 = spop %188 }
  0x5b   :  { %s37_s30 = smin.f32 %s240_s29, %s189_s27 }
  0x5c   :  { %s38_s3 = smul.f32 %s255_s10, %s37_s30 }
  0x5e   :  { %40 = sst [smem:[#allocation5 + $0x1]] %s38_s3 }
  0x65   :  { %s191_s7 = spop %190 }
  0x66   :  { %s58_s5 = smin.f32 %s240_s29, %s191_s7 }
  0x67   :  { %s59_s6 = smul.f32 %s257_s11, %s58_s5 }
  0x69   :  { %61 = sst [smem:[#allocation5 + $0x2]] %s59_s6 }
  0x6c   :  { %s193_s4 = spop %192 }
  0x6d   :  { %s79_s8 = smin.f32 %s240_s29, %s193_s4 }
  0x6e   :  { %s80_s9 = smul.f32 %s260_s17, %s79_s8 }
  0x70   :  { %82 = sst [smem:[#allocation5 + $0x3]] %s80_s9 }
  0x73   :  { %s195_s12 = spop %194 }
  0x74   :  { %s100_s13 = smin.f32 %s240_s29, %s195_s12 }
  0x75   :  { %s101_s15 = smul.f32 %s263_s23, %s100_s13 }
  0x77   :  { %103 = sst [smem:[#allocation5 + $0x4]] %s101_s15 }
  0x7a   :  { %s197_s19 = spop %196 }
  0x7b   :  { %s121_s0 = smin.f32 %s240_s29, %s197_s19 }
  0x7c   :  { %s122_s18 = smul.f32 %s266_s2, %s121_s0 }
  0x7e   :  { %124 = sst [smem:[#allocation5 + $0x5]] %s122_s18 }
  0x81   :  { %s199_s10 = spop %198 }
  0x82   :  { %s142_s16 = smin.f32 %s240_s29, %s199_s10 }
  0x83   :  { %s143_s20 = smul.f32 %s269_s14, %s142_s16 }
  0x85   :  { %145 = sst [smem:[#allocation5 + $0x6]] %s143_s20 }
  0x88   :  { %s201_s11 = spop %200 }
  0x89   :  { %s163_s21 = smin.f32 %s240_s29, %s201_s11 }
  0x8a   :  { %s164_s24 = smul.f32 %s272_s25, %s163_s21 }
  0x8c   :  { %166 = sst [smem:[#allocation5 + $0x7]] %s164_s24 }
  0x8d   :  { %174 = dma.smem_to_hbm %s241_s22, 16, %s287_s1, [#allocation4]  }
  0x8e   :  { %237 = dma.done.wait [#allocation4], 16  }
  0x8f   :  { %238 = vsyncadd [#allocation4], 4294967280 }
  0x90   :  { %178 = sfence }
  0x91   :  { %179 = vsyncpa [#allocation3], 1 }
  0x92   :  { %180 = vsyncpa [#allocation4], 1 }

</bundles_post_ra>
